<compile_context>
chip_gen: v7x
topology: tpu7x:2x2x1
jax: 0.10.0
libtpu: 0.0.40
codegen_flags: <defaults>
</compile_context>

<pallas_src>
import functools

import jax
import jax.numpy as jnp
from jax import lax
from jax.experimental import pallas as pl
from jax.experimental.pallas import tpu as pltpu


# -----------------------------------------------------------------------------
# Fused Pallas kernel
# -----------------------------------------------------------------------------
def fused_sinkhorn_kernel(x_ref, k_ref, out_ref, *, epsilon, num_iters):
    x = x_ref[...]                                    # (Bq, C) memory logits, f32
    Bq, C = x.shape

    # ---- Phase 1: stabilized exp in the lane-dense (C, Bq) layout -----------
    xt = x.T                                          # (C, Bq) -- exact XLU transpose
    m = jnp.max(xt)                                   # global max over the memory
    Q = jnp.exp((xt - m) * (1.0 / epsilon))           # (C, Bq) == reference Q

    # ---- Phase 2: per-cluster sums and descending rank (replaces argsort) ---
    s_col = jnp.sum(Q, axis=1, keepdims=True)         # (C, 1) == sum(Q, dim=1)
    s_sub = jnp.broadcast_to(s_col, (C, C))           # s[c]  constant along lanes
    s_lane = s_sub.T                                  # s[r]  along lanes; exact copy
    r_idx = lax.broadcasted_iota(jnp.int32, (C, C), 1)    # comparing cluster r (lanes)
    c_idx = lax.broadcasted_iota(jnp.int32, (C, C), 0)    # ranked cluster c (sublanes)
    greater = s_lane > s_sub
    # Stable tie-break by index (exact ties are measure-zero for real inputs).
    tie_first = jnp.logical_and(s_lane == s_sub, r_idx < c_idx)
    rank = jnp.sum(jnp.logical_or(greater, tie_first).astype(jnp.float32),
                   axis=1, keepdims=True)             # (C, 1), values in [0, C-1]

    # ---- Phase 3: permuted prior  K[rank[c]] = exp(w[rank[c]] * a) / Z ------
    # a = log(sigmoid(learn_k)) computed in-kernel from the raw SMEM scalar,
    # vectorized as (1,1) so exp/log run on the EUP rather than the scalar core.
    neg_lk = jnp.broadcast_to(-k_ref[0, 0], (1, 1))
    a = -jnp.log(1.0 + jnp.exp(neg_lk))               # (1, 1) log-sigmoid(learn_k)
    w_scale = 1.0 / (C - 1)
    w_col = lax.broadcasted_iota(jnp.int32, (C, 1), 0).astype(jnp.float32) * w_scale
    z = jnp.sum(jnp.exp(w_col * a), axis=0, keepdims=True)     # (1, 1) softmax denom
    k_perm = jnp.exp(rank * w_scale * a) / z                   # (C, 1), exact 1/z

    # ---- Phase 4: Sinkhorn-Knopp iterations, entirely in (C, Bq) -------------
    # The reference's Q /= sum(Q), in-loop Q /= B and final Q *= B are uniform
    # scales removed exactly by the next normalization before the clamp, so all
    # three are folded away (valid as long as the 1e-16 clamp never binds on
    # non-negligible entries).
    # TODO(synk): at large C/Bq, compute both reductions as MXU matmuls against
    # a ones vector instead of XLU jnp.sum reductions.
    sum_of_rows = s_col                               # iteration 0 reuses Phase-2 sums
    for it in range(num_iters):                       # num_iters is tiny (3): static unroll
        last = it + 1 == num_iters                    # (switch to fori_loop if it grows >4)
        if it > 0:
            sum_of_rows = jnp.sum(Q, axis=1, keepdims=True)     # (C, 1)
        # Fused per-row factor: 1/sum_of_rows and K[rank] combined in one (C,1)
        # vreg op so the full matrix is touched once.  Final iteration is exact.
        if last:
            scale = k_perm / sum_of_rows
        else:
            scale = k_perm * pl.reciprocal(sum_of_rows, approx=True)
        Q = jnp.maximum(Q * scale, 1e-16)             # row scale + clamp(min=1e-16)
        q_sum = jnp.sum(Q, axis=0, keepdims=True)     # (1, Bq) per-sample sums
        if last:
            Q = Q / q_sum                             # exact final normalization
        else:
            Q = Q * pl.reciprocal(q_sum, approx=True)

    out_ref[...] = Q.T                                # (Bq, C) == returned Q.t()


@functools.partial(jax.jit, static_argnames=("epsilon", "num_iters"))
def fused_sinkhorn(memory_logits, learn_k, *, epsilon, num_iters):
    Bq, C = memory_logits.shape
    kernel = functools.partial(fused_sinkhorn_kernel,
                               epsilon=float(epsilon), num_iters=int(num_iters))
    return pl.pallas_call(
        kernel,
        out_shape=jax.ShapeDtypeStruct((Bq, C), jnp.float32),
        in_specs=[
            pl.BlockSpec((Bq, C), lambda: (0, 0)),                 # whole block in VMEM
            pl.BlockSpec(memory_space=pltpu.MemorySpace.SMEM),     # raw learn_k scalar
        ],
        out_specs=pl.BlockSpec((Bq, C), lambda: (0, 0)),
    )(memory_logits.astype(jnp.float32),
      learn_k.astype(jnp.float32).reshape(1, 1))


# -----------------------------------------------------------------------------
# Pure-JAX port of the PyTorch reference (for in-script validation only)
# -----------------------------------------------------------------------------
def sinkhorn_reference(memory_logits, log_sig_k, epsilon, num_iters):
    C = memory_logits.shape[1]
    w = (jnp.arange(C, dtype=jnp.float32) / (C - 1)).reshape(1, -1)
    K = jax.nn.softmax(w * log_sig_k, axis=1)
    x = memory_logits - jnp.max(memory_logits)
    Q = jnp.exp(x / epsilon).T
    B = Q.shape[1]
    order = jnp.argsort(-jnp.sum(Q, axis=1))
    Q = Q[order]
    Q = Q / jnp.sum(Q)
    for _ in range(num_iters):
        Q = Q / jnp.sum(Q, axis=1, keepdims=True)
        Q = (Q.T * K).T
        Q = jnp.maximum(Q, 1e-16)
        Q = Q / jnp.sum(Q, axis=0, keepdims=True)
        Q = Q / B
    Q = Q * B
    reorder = jnp.argsort(order)
    return Q[reorder].T


# -----------------------------------------------------------------------------
# Module equivalents
# -----------------------------------------------------------------------------
class ImbalancedSinkhornKnoppPallas:
    """Forward-equivalent of Imbalanced_SinkhornKnopp backed by one fused Pallas kernel."""

    def __init__(self, num_iters=3, epsilon=0.5, batch_size=16, num_cluster=16):
        self.num_iters = num_iters
        self.epsilon = epsilon
        self.batch_size = batch_size
        self.num_cluster = num_cluster
        self.idx = 0
        self.order = None  # sort order is never materialized (rank computed in-kernel)
        # Parameters mirroring the torch module's __init__.
        self.w0 = jnp.ones((1, num_cluster), jnp.float32) / num_cluster
        self.learn_k = jnp.ones((1,), jnp.float32) * 5.0
        self.w = (jnp.arange(num_cluster, dtype=jnp.float32) / (num_cluster - 1)).reshape(1, -1)

    def forward(self, logits, labels, sk_memory, is_update):
        memory_logits, idx = sk_memory(logits, labels, is_update)
        self.idx = sk_memory.queueSize if idx == 0 else idx
        # Raw learn_k goes straight into the kernel (SMEM scalar); log-sigmoid,
        # softmax(w * .) and its data-dependent permutation are all in-kernel.
        return fused_sinkhorn(memory_logits, self.learn_k,
                              epsilon=self.epsilon, num_iters=self.num_iters)

    def get_w(self):
        return jax.nn.log_softmax(self.w * jnp.log(jax.nn.sigmoid(self.learn_k)), axis=1)

    def get_w0(self):
        return jax.nn.softmax(-self.w * jnp.log(jnp.exp(-5.0) + 1.0), axis=1)


class BalancedSinkhornPallas:
    """Forward-only analogue of Balanced_sinkhorn."""

    def __init__(self, epsilon_sk=0.5, num_cluster=16, sk_memory=None):
        self.sk = ImbalancedSinkhornKnoppPallas(
            num_iters=3, epsilon=epsilon_sk,
            batch_size=sk_memory.queueSize, num_cluster=num_cluster)
        # TODO(synk): the SGD(momentum) update of learn_k driven by
        # -mean(sum(Q*preds)) + gamma * KLDiv(get_w(), get_w0()) needs autograd
        # and an optimizer step; there is no Pallas forward-pass equivalent.

    def forward(self, logits, sk_memory, labels=None, num_outer_iters=1):
        Q = None
        is_update = True
        for _ in range(num_outer_iters):
            Q = self.sk.forward(logits, labels, sk_memory, is_update=is_update)
            is_update = False
        idx = self.sk.idx
        return Q[idx - logits.shape[0]: idx]


class SimpleSKMemory:
    # TODO(synk): the real SK_memory module is external to this file; this is a
    # deterministic FIFO-queue stand-in with the same (memory_logits, idx) interface.
    def __init__(self, queue_size, num_cluster, key):
        self.queueSize = queue_size
        self.memory = jax.random.normal(key, (queue_size, num_cluster), jnp.float32)
        self.idx = 0

    def __call__(self, logits, labels, is_update):
        bs = logits.shape[0]
        if is_update:
            self.memory = jax.lax.dynamic_update_slice(self.memory, logits, (self.idx, 0))
            self.idx = (self.idx + bs) % self.queueSize
        return self.memory, self.idx


# -----------------------------------------------------------------------------
# Main
# -----------------------------------------------------------------------------
if __name__ == "__main__":
    num_cluster = 16
    batch = 16
    queue_size = 64

    key = jax.random.PRNGKey(0)
    k_logits, k_mem = jax.random.split(key)
    logits = jax.random.normal(k_logits, (batch, num_cluster), jnp.float32)
    labels = jnp.arange(batch, dtype=jnp.int32) % num_cluster

    sk_memory = SimpleSKMemory(queue_size, num_cluster, k_mem)
    balanced = BalancedSinkhornPallas(epsilon_sk=0.5, num_cluster=num_cluster,
                                      sk_memory=sk_memory)

    # Full-queue assignment from the fused Pallas kernel (default learn_k = 5).
    Q_full = balanced.sk.forward(logits, labels, sk_memory, is_update=True)
    Q_full = jax.block_until_ready(Q_full)
    assert Q_full.shape == (queue_size, num_cluster), Q_full.shape
    assert bool(jnp.all(jnp.isfinite(Q_full))), "NaN/Inf in output Q"

    a0 = float(jnp.log(jax.nn.sigmoid(balanced.sk.learn_k))[0])
    ref0 = sinkhorn_reference(sk_memory.memory.astype(jnp.float32), a0, 0.5, 3)
    assert bool(jnp.allclose(Q_full, ref0, rtol=2e-2, atol=1e-4)), \
        float(jnp.max(jnp.abs(Q_full - ref0)))

    # Second check with a strongly non-uniform prior (exercises the in-kernel
    # log-sigmoid / rank / K-permutation path); memory is not updated this time.
    balanced.sk.learn_k = jnp.array([-2.0], jnp.float32)
    Q2 = jax.block_until_ready(
        balanced.sk.forward(logits, labels, sk_memory, is_update=False))
    a1 = float(jnp.log(jax.nn.sigmoid(balanced.sk.learn_k))[0])
    ref1 = sinkhorn_reference(sk_memory.memory.astype(jnp.float32), a1, 0.5, 3)
    assert bool(jnp.allclose(Q2, ref1, rtol=2e-2, atol=1e-4)), \
        float(jnp.max(jnp.abs(Q2 - ref1)))

    # Balanced_sinkhorn-style current_Q slice (restore the default prior first).
    balanced.sk.learn_k = jnp.ones((1,), jnp.float32) * 5.0
    current_Q = jax.block_until_ready(
        balanced.forward(logits, sk_memory, labels=labels, num_outer_iters=1))
    assert current_Q.shape == (batch, num_cluster), current_Q.shape

    print("KERNEL_OK")
</pallas_src>

<mosaic_0001>
module attributes {stable_mosaic.version = 11 : i64} {
  func.func @fused_sinkhorn_kernel(%arg0: memref<64x16xf32, #tpu.memory_space<vmem>>, %arg1: memref<1x1xf32, #tpu.memory_space<smem>>, %arg2: memref<64x16xf32, #tpu.memory_space<vmem>>) attributes {dimension_semantics = [], scalar_prefetch = 0 : i64, scratch_operands = 0 : i64, tpu.core_type = #tpu.core_type<tc>} {
    %c0 = arith.constant 0 : index
    %c0_0 = arith.constant 0 : index
    %0 = vector.load %arg0[%c0, %c0_0] : memref<64x16xf32, #tpu.memory_space<vmem>>, vector<64x16xf32>
    %1 = tpu.transpose %0, [1, 0] : vector<64x16xf32> -> vector<16x64xf32>
    %2 = vector.shape_cast %1 : vector<16x64xf32> to vector<1x16x64xf32>
    %cst = arith.constant dense<0xFF800000> : vector<1xf32>
    %3 = vector.multi_reduction <maximumf>, %2, %cst [1, 2] : vector<1x16x64xf32> to vector<1xf32>
    %4 = vector.shape_cast %3 : vector<1xf32> to vector<1x1x1xf32>
    %5 = vector.extract %4[0, 0, 0] : f32 from vector<1x1x1xf32>
    %6 = vector.broadcast %5 : f32 to vector<16x64xf32>
    %7 = arith.subf %1, %6 : vector<16x64xf32>
    %cst_1 = arith.constant 2.000000e+00 : f32
    %8 = vector.broadcast %cst_1 : f32 to vector<16x64xf32>
    %9 = arith.mulf %7, %8 : vector<16x64xf32>
    %10 = math.exp %9 : vector<16x64xf32>
    %cst_2 = arith.constant dense<0.000000e+00> : vector<16xf32>
    %11 = vector.multi_reduction <add>, %10, %cst_2 [1] : vector<16x64xf32> to vector<16xf32>
    %12 = vector.shape_cast %11 : vector<16xf32> to vector<16x1xf32>
    %13 = vector.shape_cast %12 : vector<16x1xf32> to vector<16x1xf32>
    %14 = vector.broadcast %13 : vector<16x1xf32> to vector<16x16xf32>
    %15 = tpu.transpose %14, [1, 0] : vector<16x16xf32> -> vector<16x16xf32>
    %16 = tpu.iota {dimensions = array<i32: 1>} : vector<16x16xi32>
    %17 = tpu.iota {dimensions = array<i32: 0>} : vector<16x16xi32>
    %18 = arith.cmpf ogt, %15, %14 : vector<16x16xf32>
    %19 = arith.cmpf oeq, %15, %14 : vector<16x16xf32>
    %20 = arith.cmpi slt, %16, %17 : vector<16x16xi32>
    %21 = arith.andi %19, %20 : vector<16x16xi1>
    %22 = arith.ori %18, %21 : vector<16x16xi1>
    %23 = arith.extui %22 : vector<16x16xi1> to vector<16x16xi32>
    %24 = arith.sitofp %23 : vector<16x16xi32> to vector<16x16xf32>
    %cst_3 = arith.constant dense<0.000000e+00> : vector<16xf32>
    %25 = vector.multi_reduction <add>, %24, %cst_3 [1] : vector<16x16xf32> to vector<16xf32>
    %26 = vector.shape_cast %25 : vector<16xf32> to vector<16x1xf32>
    %c0_4 = arith.constant 0 : index
    %c0_5 = arith.constant 0 : index
    %27 = memref.load %arg1[%c0_4, %c0_5] : memref<1x1xf32, #tpu.memory_space<smem>>
    %cst_6 = arith.constant 0.000000e+00 : f32
    %28 = arith.subf %cst_6, %27 : f32
    %29 = vector.broadcast %28 : f32 to vector<1x1xf32>
    %30 = math.exp %29 : vector<1x1xf32>
    %cst_7 = arith.constant 1.000000e+00 : f32
    %31 = vector.broadcast %cst_7 : f32 to vector<1x1xf32>
    %32 = arith.addf %31, %30 : vector<1x1xf32>
    %33 = math.log %32 : vector<1x1xf32>
    %cst_8 = arith.constant 0.000000e+00 : f32
    %34 = vector.broadcast %cst_8 : f32 to vector<1x1xf32>
    %35 = arith.subf %34, %33 : vector<1x1xf32>
    %36 = tpu.iota {dimensions = array<i32: 0>} : vector<16x1xi32>
    %37 = arith.sitofp %36 : vector<16x1xi32> to vector<16x1xf32>
    %cst_9 = arith.constant 0.0666666701 : f32
    %38 = vector.broadcast %cst_9 : f32 to vector<16x1xf32>
    %39 = arith.mulf %37, %38 : vector<16x1xf32>
    %40 = vector.broadcast %35 : vector<1x1xf32> to vector<16x1xf32>
    %41 = arith.mulf %39, %40 : vector<16x1xf32>
    %42 = math.exp %41 : vector<16x1xf32>
    %cst_10 = arith.constant dense<0.000000e+00> : vector<1xf32>
    %43 = vector.multi_reduction <add>, %42, %cst_10 [0] : vector<16x1xf32> to vector<1xf32>
    %44 = vector.shape_cast %43 : vector<1xf32> to vector<1x1xf32>
    %cst_11 = arith.constant 0.0666666701 : f32
    %45 = vector.broadcast %cst_11 : f32 to vector<16x1xf32>
    %46 = arith.mulf %26, %45 : vector<16x1xf32>
    %47 = vector.broadcast %35 : vector<1x1xf32> to vector<16x1xf32>
    %48 = arith.mulf %46, %47 : vector<16x1xf32>
    %49 = math.exp %48 : vector<16x1xf32>
    %50 = vector.broadcast %44 : vector<1x1xf32> to vector<16x1xf32>
    %51 = arith.divf %49, %50 : vector<16x1xf32>
    %52 = tpu.reciprocal %12 {approx = true} : vector<16x1xf32> -> vector<16x1xf32>
    %53 = arith.mulf %51, %52 : vector<16x1xf32>
    %54 = vector.broadcast %53 : vector<16x1xf32> to vector<16x64xf32>
    %55 = arith.mulf %10, %54 : vector<16x64xf32>
    %cst_12 = arith.constant 1.000000e-16 : f32
    %56 = vector.broadcast %cst_12 : f32 to vector<16x64xf32>
    %57 = arith.maximumf %55, %56 : vector<16x64xf32>
    %cst_13 = arith.constant dense<0.000000e+00> : vector<64xf32>
    %58 = vector.multi_reduction <add>, %57, %cst_13 [0] : vector<16x64xf32> to vector<64xf32>
    %59 = vector.shape_cast %58 : vector<64xf32> to vector<1x64xf32>
    %60 = tpu.reciprocal %59 {approx = true} : vector<1x64xf32> -> vector<1x64xf32>
    %61 = vector.broadcast %60 : vector<1x64xf32> to vector<16x64xf32>
    %62 = arith.mulf %57, %61 : vector<16x64xf32>
    %cst_14 = arith.constant dense<0.000000e+00> : vector<16xf32>
    %63 = vector.multi_reduction <add>, %62, %cst_14 [1] : vector<16x64xf32> to vector<16xf32>
    %64 = vector.shape_cast %63 : vector<16xf32> to vector<16x1xf32>
    %65 = tpu.reciprocal %64 {approx = true} : vector<16x1xf32> -> vector<16x1xf32>
    %66 = arith.mulf %51, %65 : vector<16x1xf32>
    %67 = vector.broadcast %66 : vector<16x1xf32> to vector<16x64xf32>
    %68 = arith.mulf %62, %67 : vector<16x64xf32>
    %cst_15 = arith.constant 1.000000e-16 : f32
    %69 = vector.broadcast %cst_15 : f32 to vector<16x64xf32>
    %70 = arith.maximumf %68, %69 : vector<16x64xf32>
    %cst_16 = arith.constant dense<0.000000e+00> : vector<64xf32>
    %71 = vector.multi_reduction <add>, %70, %cst_16 [0] : vector<16x64xf32> to vector<64xf32>
    %72 = vector.shape_cast %71 : vector<64xf32> to vector<1x64xf32>
    %73 = tpu.reciprocal %72 {approx = true} : vector<1x64xf32> -> vector<1x64xf32>
    %74 = vector.broadcast %73 : vector<1x64xf32> to vector<16x64xf32>
    %75 = arith.mulf %70, %74 : vector<16x64xf32>
    %cst_17 = arith.constant dense<0.000000e+00> : vector<16xf32>
    %76 = vector.multi_reduction <add>, %75, %cst_17 [1] : vector<16x64xf32> to vector<16xf32>
    %77 = vector.shape_cast %76 : vector<16xf32> to vector<16x1xf32>
    %78 = arith.divf %51, %77 : vector<16x1xf32>
    %79 = vector.broadcast %78 : vector<16x1xf32> to vector<16x64xf32>
    %80 = arith.mulf %75, %79 : vector<16x64xf32>
    %cst_18 = arith.constant 1.000000e-16 : f32
    %81 = vector.broadcast %cst_18 : f32 to vector<16x64xf32>
    %82 = arith.maximumf %80, %81 : vector<16x64xf32>
    %cst_19 = arith.constant dense<0.000000e+00> : vector<64xf32>
    %83 = vector.multi_reduction <add>, %82, %cst_19 [0] : vector<16x64xf32> to vector<64xf32>
    %84 = vector.shape_cast %83 : vector<64xf32> to vector<1x64xf32>
    %85 = vector.broadcast %84 : vector<1x64xf32> to vector<16x64xf32>
    %86 = arith.divf %82, %85 : vector<16x64xf32>
    %87 = tpu.transpose %86, [1, 0] : vector<16x64xf32> -> vector<64x16xf32>
    %c0_20 = arith.constant 0 : index
    %c0_21 = arith.constant 0 : index
    %88 = vector.load %arg2[%c0_20, %c0_21] : memref<64x16xf32, #tpu.memory_space<vmem>>, vector<64x16xf32>
    tpu.vector_store %arg2[%c0_20, %c0_21], %87 {strides = array<i32>} : memref<64x16xf32, #tpu.memory_space<vmem>>, vector<64x16xf32>,
    return
  }
}

</mosaic_0001>

<bundles_post_ra>
// kernel: fused_sinkhorn.1
= control target key start
LH: loop header
LB: loop body
LE: loop exit
PB: predicated region body
PF: predicated region fallthrough
CT: control target
= control target key end

     0   :  { %vm52_vm0 = vcmask 523264   ;;  %v112_v33 = vlaneseq  ;;  %vm131_vm5 = vcmask 130048   ;;  %v332_v39 = vmov 0.0   ;;  %s443_s0 = inlined_call_operand.vmem [shape: f32[64,16], index: 0, kind: input, shape index: {}]   ;;  %s444_s1 = inlined_call_operand.<no memory space> [shape: f32[1,1], index: 1, kind: input, shape index: {}]   ;;  %s445_s2 = inlined_call_operand.vmem [shape: f32[64,16], index: 2, kind: output, shape index: {}]  }
   0x1   :  { %v12_v0 = vld [vmem:[%s443_s0] sm:$0xff]  ;;  %v13_v1 = vld [vmem:[%s443_s0 + $0x8] sm:$0xff]  ;;  %v14_v2 = vld [vmem:[%s443_s0 + $0x10] sm:$0xff]  ;;  %s139_s27 = ssub.f32 0.0, %s444_s1 }
   0x2   :  { %20 = vxpose.xlu0.b32.start [1/8] (short) (narrow) %v12_v0, 16  ;;  %v15_v3 = vld [vmem:[%s443_s0 + $0x18] sm:$0xff]  ;;  %v16_v4 = vld [vmem:[%s443_s0 + $0x20] sm:$0xff]  ;;  %v17_v5 = vld [vmem:[%s443_s0 + $0x28] sm:$0xff]  ;;  %v113_v34 = vand.u32 127, %v112_v33  ;;  %v115_v35 = vshrl.u32 %v112_v33, 7 }
   0x3   :  { %v18_v6 = vld [vmem:[%s443_s0 + $0x30] sm:$0xff]  ;;  %v19_v7 = vld [vmem:[%s443_s0 + $0x38] sm:$0xff]  ;;  %v140_v44 = vstv %s139_s27 }
   0x4   :  { %vm121_vm1 = vcmp.lt.s32.totalorder %v113_v34, %v115_v35  ;;  %v116_v36 = vadd.s32 8, %v115_v35  ;;  %v141_v45 = vmul.f32 1.442695, %v140_v44  ;;  %v147_v49 = vcvt.s32.f32 %v115_v35 }
   0x6   :  { %21 = vxpose.xlu0.b32.cont [2/8] (short) (narrow) %v13_v1, 16  ;;  %vm122_vm6 = vcmp.lt.s32.totalorder %v113_v34, %v116_v36  ;;  %v148_v51 = vcvt.s32.f32 %v116_v36  ;;  %v149_v52 = vmul.f32 0.06666667, %v147_v49 }
   0x8   :  { %v150_v54 = vmul.f32 0.06666667, %v148_v51 }
   0xa   :  { %22 = vxpose.xlu0.b32.cont [3/8] (short) (narrow) %v14_v2, 16 }
   0xe   :  { %23 = vxpose.xlu0.b32.cont [4/8] (short) (narrow) %v15_v3, 16 }
  0x12   :  { %24 = vxpose.xlu0.b32.cont [5/8] (short) (narrow) %v16_v4, 16 }
  0x16   :  { %25 = vxpose.xlu0.b32.cont [6/8] (short) (narrow) %v17_v5, 16 }
  0x1a   :  { %26 = vxpose.xlu0.b32.cont [7/8] (short) (narrow) %v18_v6, 16 }
  0x1e   :  { %27 = vxpose.xlu0.b32.end [8/8] (short) (narrow) %v19_v7, 16 }
  0x82   :  { %v36_v8 = vpop.trf.xlu0 }
  0x83   :  { %v53_v10 = vsel %vm52_vm0, %v36_v8, -inf }
  0x86   :  { %v37_v9 = vpop.trf.xlu0 }
  0x87   :  { %v54_v11 = vsel %vm52_vm0, %v37_v9, -inf }
  0x88   :  { %v55_v12 = vmax.f32 %v53_v10, %v54_v11 }
  0x8a   :  { %56 = vmax.xlane.f32.xlu1 %v55_v12 }
 0x117   :  { %v57_v13 = vpop.xlane.xlu1 %56 }
 0x118   :  { %v58_v14 = vrot.slane %v57_v13, 4 }
 0x11a   :  { %v59_v15 = vmax.f32 %v57_v13, %v58_v14 }
 0x11c   :  { %v60_v16 = vrot.slane %v59_v15, 2 }
 0x11e   :  { %v61_v17 = vmax.f32 %v59_v15, %v60_v16 }
 0x120   :  { %v62_v18 = vrot.slane %v61_v17, 1 }
 0x122   :  { %v63_v19 = vmax.f32 %v61_v17, %v62_v18 }
 0x124   :  { %293 = vpush %v63_v19 }
 0x155   :  { %s294_s25 = spop %293 }
 0x156   :  { %v65_v20 = vstv %s294_s25 }
 0x157   :  { %v66_v21 = vsub.f32 %v36_v8, %v65_v20  ;;  %v67_v22 = vsub.f32 %v37_v9, %v65_v20 }
 0x159   :  { %v68_v23 = vmul.f32 2.0, %v66_v21  ;;  %v69_v24 = vmul.f32 2.0, %v67_v22 }
 0x15b   :  { %v70_v25 = vmul.f32 1.442695, %v68_v23  ;;  %v72_v26 = vmul.f32 1.442695, %v69_v24 }
 0x15d   :  { %296 = vpow2.f32 %v70_v25 }
 0x15e   :  { %298 = vpow2.f32 %v72_v26 }
 0x15f   :  { %300 = vpow2.f32 %v141_v45 }
 0x167   :  { %v374_v27 = vpop.eup %296 }
 0x168   :  { %v74_v28 = vsel %vm52_vm0, %v374_v27, 0.0  ;;  %v378_v29 = vpop.eup %298 }
 0x169   :  { %75 = vadd.xlane.f32.xlu1 %v74_v28  ;;  %v77_v30 = vsel %vm52_vm0, %v378_v29, 0.0  ;;  %v301_v46 = vpop.eup %300 }
 0x16a   :  { %v143_v47 = vadd.f32 1.0, %v301_v46 }
 0x16c   :  { %302 = vlog2.f32 %v143_v47 }
 0x16d   :  { %78 = vadd.xlane.f32.xlu1 %v77_v30 }
 0x176   :  { %v303_v48 = vpop.eup %302 }
 0x177   :  { %v145_v50 = vmul.f32 0.6931472, %v303_v48 }
 0x179   :  { %v146_v53 = vsub.f32 0.0, %v145_v50 }
 0x17b   :  { %v151_v55 = vmul.f32 %v149_v52, %v146_v53  ;;  %v152_v56 = vmul.f32 %v150_v54, %v146_v53 }
 0x17d   :  { %v153_v57 = vmul.f32 1.442695, %v151_v55  ;;  %v155_v58 = vmul.f32 1.442695, %v152_v56 }
 0x17f   :  { %304 = vpow2.f32 %v153_v57 }
 0x180   :  { %306 = vpow2.f32 %v155_v58 }
 0x189   :  { %v305_v59 = vpop.eup %304 }
 0x18a   :  { %v307_v60 = vpop.eup %306 }
 0x18b   :  { %v157_v61 = vadd.f32 %v307_v60, %v305_v59 }
 0x18d   :  { %v158_v62 = vrot.slane %v157_v61, 4 }
 0x18f   :  { %v159_v63 = vadd.f32 %v158_v62, %v157_v61 }
 0x191   :  { %v160_v0 = vrot.slane %v159_v63, 2 }
 0x193   :  { %v161_v1 = vadd.f32 %v160_v0, %v159_v63 }
 0x195   :  { %v162_v2 = vrot.slane %v161_v1, 1 }
 0x197   :  { %v163_v5 = vadd.f32 %v162_v2, %v161_v1 }
 0x199   :  { %308 = vrcp.f32 %v163_v5 }
 0x1a3   :  { %v309_v12 = vpop.eup %308 }
 0x1f6   :  { %v382_v31 = vpop.xlane.xlu1 %75 }
 0x1f7   :  { %80 = vxpose.xlu1.b32.start [1/2] (short) (narrow) %v382_v31, 16 }
 0x1fa   :  { %v385_v32 = vpop.xlane.xlu1 %78 }
 0x1fb   :  { %81 = vxpose.xlu1.b32.end [2/2] (short) (narrow) %v385_v32, 16 }
 0x277   :  { %v96_v37 = vpop.trf.xlu1 }
 0x278   :  { %vm117_vm2 = vcmp.gt.f32.partialorder %v96_v37, %v382_v31  ;;  %vm119_vm3 = vcmp.eq.f32.partialorder %v96_v37, %v382_v31 }
 0x279   :  { %vm123_vm4 = vmand %vm119_vm3, %vm121_vm1 }
 0x27a   :  { %vm125_vm7 = vmor %vm117_vm2, %vm123_vm4 }
 0x27b   :  { %v97_v38 = vpop.trf.xlu1  ;;  %v291_v40 = vsel %vm125_vm7, 1.0, %v332_v39 }
 0x27c   :  { %vm118_vm8 = vcmp.gt.f32.partialorder %v97_v38, %v385_v32  ;;  %vm120_vm9 = vcmp.eq.f32.partialorder %v97_v38, %v385_v32  ;;  %v132_v41 = vsel %vm131_vm5, %v291_v40, 0.0 }
 0x27d   :  { %vm124_vm10 = vmand %vm120_vm9, %vm122_vm6  ;;  %133 = vadd.xlane.f32.xlu0 %v132_v41 }
 0x27e   :  { %vm126_vm11 = vmor %vm118_vm8, %vm124_vm10 }
 0x27f   :  { %v292_v42 = vsel %vm126_vm11, 1.0, %v332_v39 }
 0x280   :  { %v135_v43 = vsel %vm131_vm5, %v292_v42, 0.0 }
 0x281   :  { %136 = vadd.xlane.f32.xlu1 %v135_v43 }
 0x30a   :  { %v134_v3 = vpop.xlane.xlu0 %133 }
 0x30b   :  { %v164_v4 = vmul.f32 0.06666667, %v134_v3 }
 0x30d   :  { %v166_v6 = vmul.f32 %v164_v4, %v146_v53 }
 0x30e   :  { %v137_v7 = vpop.xlane.xlu1 %136 }
 0x30f   :  { %v168_v8 = vmul.f32 1.442695, %v166_v6  ;;  %v165_v9 = vmul.f32 0.06666667, %v137_v7 }
 0x311   :  { %310 = vpow2.f32 %v168_v8  ;;  %v167_v10 = vmul.f32 %v165_v9, %v146_v53 }
 0x312   :  { %312 = vrcp.f32 %v382_v31 }
 0x313   :  { %v170_v11 = vmul.f32 1.442695, %v167_v10 }
 0x315   :  { %314 = vpow2.f32 %v170_v11 }
 0x316   :  { %316 = vrcp.f32 %v385_v32 }
 0x31b   :  { %v311_v13 = vpop.eup %310 }
 0x31c   :  { %v173_v14 = vmul.f32 %v311_v13, %v309_v12  ;;  %v313_v15 = vpop.eup %312 }
 0x31e   :  { %v177_v16 = vmul.f32 %v313_v15, %v173_v14 }
 0x31f   :  { %v315_v17 = vpop.eup %314 }
 0x320   :  { %v174_v18 = vmul.f32 %v315_v17, %v309_v12  ;;  %v179_v19 = vmul.f32 %v374_v27, %v177_v16  ;;  %v317_v20 = vpop.eup %316 }
 0x322   :  { %v178_v21 = vmul.f32 %v317_v20, %v174_v18  ;;  %v181_v23 = vmax.f32 %v179_v19, 1e-16 }
 0x324   :  { %v180_v22 = vmul.f32 %v378_v29, %v178_v21  ;;  %v183_v25 = vsel %vm52_vm0, %v181_v23, 0.0 }
 0x326   :  { %v182_v24 = vmax.f32 %v180_v22, 1e-16 }
 0x328   :  { %v184_v26 = vsel %vm52_vm0, %v182_v24, 0.0 }
 0x329   :  { %v185_v28 = vadd.f32 %v184_v26, %v183_v25 }
 0x32b   :  { %v186_v30 = vrot.slane %v185_v28, 4 }
 0x32d   :  { %v187_v31 = vadd.f32 %v186_v30, %v185_v28 }
 0x32f   :  { %v188_v32 = vrot.slane %v187_v31, 2 }
 0x331   :  { %v189_v33 = vadd.f32 %v188_v32, %v187_v31 }
 0x333   :  { %v190_v34 = vrot.slane %v189_v33, 1 }
 0x335   :  { %v191_v35 = vadd.f32 %v190_v34, %v189_v33 }
 0x337   :  { %318 = vrcp.f32 %v191_v35 }
 0x341   :  { %v319_v36 = vpop.eup %318 }
 0x342   :  { %v193_v27 = vmul.f32 %v319_v36, %v181_v23  ;;  %v194_v38 = vmul.f32 %v319_v36, %v182_v24 }
 0x344   :  { %v195_v37 = vsel %vm52_vm0, %v193_v27, 0.0  ;;  %v198_v29 = vsel %vm52_vm0, %v194_v38, 0.0 }
 0x345   :  { %196 = vadd.xlane.f32.xlu0 %v195_v37 }
 0x349   :  { %199 = vadd.xlane.f32.xlu0 %v198_v29 }
 0x3d2   :  { %v197_v39 = vpop.xlane.xlu0 %196 }
 0x3d3   :  { %320 = vrcp.f32 %v197_v39 }
 0x3d6   :  { %v200_v40 = vpop.xlane.xlu0 %199 }
 0x3d7   :  { %322 = vrcp.f32 %v200_v40 }
 0x3dd   :  { %v321_v41 = vpop.eup %320 }
 0x3de   :  { %v203_v42 = vmul.f32 %v321_v41, %v173_v14 }
 0x3e0   :  { %v205_v43 = vmul.f32 %v203_v42, %v193_v27 }
 0x3e1   :  { %v323_v44 = vpop.eup %322 }
 0x3e2   :  { %v204_v45 = vmul.f32 %v323_v44, %v174_v18  ;;  %v207_v47 = vmax.f32 %v205_v43, 1e-16 }
 0x3e4   :  { %v206_v46 = vmul.f32 %v204_v45, %v194_v38  ;;  %v209_v49 = vsel %vm52_vm0, %v207_v47, 0.0 }
 0x3e6   :  { %v208_v48 = vmax.f32 %v206_v46, 1e-16 }
 0x3e8   :  { %v210_v50 = vsel %vm52_vm0, %v208_v48, 0.0 }
 0x3e9   :  { %v211_v51 = vadd.f32 %v210_v50, %v209_v49 }
 0x3eb   :  { %v212_v52 = vrot.slane %v211_v51, 4 }
 0x3ed   :  { %v213_v53 = vadd.f32 %v212_v52, %v211_v51 }
 0x3ef   :  { %v214_v54 = vrot.slane %v213_v53, 2 }
 0x3f1   :  { %v215_v55 = vadd.f32 %v214_v54, %v213_v53 }
 0x3f3   :  { %v216_v56 = vrot.slane %v215_v55, 1 }
 0x3f5   :  { %v217_v57 = vadd.f32 %v216_v56, %v215_v55 }
 0x3f7   :  { %324 = vrcp.f32 %v217_v57 }
 0x401   :  { %v325_v58 = vpop.eup %324 }
 0x402   :  { %v219_v59 = vmul.f32 %v325_v58, %v207_v47  ;;  %v220_v61 = vmul.f32 %v325_v58, %v208_v48 }
 0x404   :  { %v221_v60 = vsel %vm52_vm0, %v219_v59, 0.0  ;;  %v224_v62 = vsel %vm52_vm0, %v220_v61, 0.0 }
 0x405   :  { %222 = vadd.xlane.f32.xlu0 %v221_v60 }
 0x409   :  { %225 = vadd.xlane.f32.xlu0 %v224_v62 }
 0x492   :  { %v223_v63 = vpop.xlane.xlu0 %222 }
 0x493   :  { %326 = vrcp.f32 %v223_v63 }
 0x496   :  { %v226_v0 = vpop.xlane.xlu0 %225 }
 0x497   :  { %328 = vrcp.f32 %v226_v0 }
 0x49d   :  { %v327_v1 = vpop.eup %326 }
 0x49e   :  { %v228_v2 = vmul.f32 %v327_v1, %v173_v14 }
 0x4a0   :  { %v231_v3 = vmul.f32 %v228_v2, %v219_v59 }
 0x4a1   :  { %v329_v4 = vpop.eup %328 }
 0x4a2   :  { %v230_v5 = vmul.f32 %v329_v4, %v174_v18  ;;  %v233_v7 = vmax.f32 %v231_v3, 1e-16 }
 0x4a4   :  { %v232_v6 = vmul.f32 %v230_v5, %v220_v61  ;;  %v235_v9 = vsel %vm52_vm0, %v233_v7, 0.0 }
 0x4a6   :  { %v234_v8 = vmax.f32 %v232_v6, 1e-16 }
 0x4a8   :  { %v236_v10 = vsel %vm52_vm0, %v234_v8, 0.0 }
 0x4a9   :  { %v237_v11 = vadd.f32 %v236_v10, %v235_v9 }
 0x4ab   :  { %v238_v12 = vrot.slane %v237_v11, 4 }
 0x4ad   :  { %v239_v13 = vadd.f32 %v238_v12, %v237_v11 }
 0x4af   :  { %v240_v15 = vrot.slane %v239_v13, 2 }
 0x4b1   :  { %v241_v16 = vadd.f32 %v240_v15, %v239_v13 }
 0x4b3   :  { %v242_v17 = vrot.slane %v241_v16, 1 }
 0x4b5   :  { %v243_v19 = vadd.f32 %v242_v17, %v241_v16 }
 0x4b7   :  { %330 = vrcp.f32 %v243_v19 }
 0x4c1   :  { %v331_v20 = vpop.eup %330 }
 0x4c2   :  { %v245_v14 = vmul.f32 %v331_v20, %v233_v7  ;;  %v246_v21 = vmul.f32 %v331_v20, %v234_v8 }
 0x4c4   :  { %247 = vxpose.xlu0.b32.start [1/2] (short) (narrow) %v245_v14, 64 }
 0x4c8   :  { %248 = vxpose.xlu0.b32.end [2/2] (short) (narrow) %v246_v21, 64 }
 0x544   :  { %v263_v18 = vpop.trf.xlu0 }
 0x545   :  { %279 = vst.msk [vmem:[%s445_s2] sm:$0xff] %vm131_vm5, %v263_v18 }
 0x548   :  { %v264_v22 = vpop.trf.xlu0 }
 0x549   :  { %280 = vst.msk [vmem:[%s445_s2 + $0x8] sm:$0xff] %vm131_vm5, %v264_v22 }
 0x54c   :  { %v265_v23 = vpop.trf.xlu0 }
 0x54d   :  { %281 = vst.msk [vmem:[%s445_s2 + $0x10] sm:$0xff] %vm131_vm5, %v265_v23 }
 0x550   :  { %v266_v24 = vpop.trf.xlu0 }
 0x551   :  { %282 = vst.msk [vmem:[%s445_s2 + $0x18] sm:$0xff] %vm131_vm5, %v266_v24 }
 0x554   :  { %v267_v25 = vpop.trf.xlu0 }
 0x555   :  { %283 = vst.msk [vmem:[%s445_s2 + $0x20] sm:$0xff] %vm131_vm5, %v267_v25 }
 0x558   :  { %v268_v26 = vpop.trf.xlu0 }
 0x559   :  { %284 = vst.msk [vmem:[%s445_s2 + $0x28] sm:$0xff] %vm131_vm5, %v268_v26 }
 0x55c   :  { %v269_v28 = vpop.trf.xlu0 }
 0x55d   :  { %285 = vst.msk [vmem:[%s445_s2 + $0x30] sm:$0xff] %vm131_vm5, %v269_v28 }
 0x560   :  { %v270_v30 = vpop.trf.xlu0 }
 0x561   :  { %286 = vst.msk [vmem:[%s445_s2 + $0x38] sm:$0xff] %vm131_vm5, %v270_v30 }

</bundles_post_ra>
